<compile_context>
chip_gen: v5e
topology: v5e:2x2
jax: 0.10.0
libtpu: 0.0.40
codegen_flags: <defaults>
</compile_context>

<pallas_src>
import numpy as np
import jax
import jax.numpy as jnp
from jax.experimental import pallas as pl
from jax.experimental.pallas import tpu as pltpu

MXU_DTYPE = jnp.bfloat16   # MXU-native matmul operands; accumulation stays f32
BN_EPS = 1e-5


def _make_fused_kernel(N, C, C_pad, H, W, eps):
    """relu -> 3x3 conv (one K=9*C_pad matmul over the whole batch) -> BN."""
    HW = H * W
    NHW = N * HW
    inv_count = 1.0 / float(NHW)

    def kernel(x_ref, w_ref, mask_ref, gamma_ref, beta_ref, out_ref):
        # x_ref:    (N, C_pad, HW)     f32  channels (padded to 8) on sublanes
        # w_ref:    (C, 9*C_pad)       bf16 tap-major, channel-minor weights
        # mask_ref: (9*C_pad, N*HW)    f32  0/1 conv zero-padding validity mask
        # gamma_ref/beta_ref: (C, 1)   f32
        # out_ref:  (N, C, HW)         f32

        # ReLU (VPU, f32) + lane-concatenation of the N images -> (C_pad, N*HW).
        x = jnp.concatenate(
            [jnp.maximum(x_ref[n], 0.0) for n in range(N)], axis=1)

        # im2col: 9 lane-rolled copies (XLU) stacked on the sublane axis at
        # 8-aligned offsets, then ONE precomputed-mask multiply (conv zero pad;
        # also zeroes the padded channel rows and any cross-image wraparound).
        taps = []
        for dy in range(3):
            for dx in range(3):
                s = (dy - 1) * W + (dx - 1)          # flat lane shift of this tap
                taps.append(pltpu.roll(x, shift=(-s) % NHW, axis=1) if s else x)
        col = jnp.concatenate(taps, axis=0) * mask_ref[...]   # (9*C_pad, N*HW)

        # Single MXU contraction for the whole batch, f32 accumulation.
        conv = jnp.dot(w_ref[...], col.astype(w_ref.dtype),
                       preferred_element_type=jnp.float32)     # (C, N*HW)

        # BatchNorm2d (training mode: batch stats, biased variance), two-pass.
        mean = jnp.sum(conv, axis=1, keepdims=True) * inv_count       # (C, 1)
        centered = conv - mean
        var = jnp.sum(centered * centered, axis=1, keepdims=True) * inv_count
        scale = gamma_ref[...] * jax.lax.rsqrt(var + eps)              # EUP
        y = centered * scale + beta_ref[...]                           # (C, N*HW)

        # Lane-dense stores back to per-image layout (static 128-multiple slices).
        for n in range(N):
            out_ref[n] = y[:, n * HW:(n + 1) * HW]

    return kernel


def _tap_masks(N, C, C_pad, H, W):
    """Host-side constant: (9*C_pad, N*H*W) 0/1 conv-padding mask per tap.

    Rows for padded channels (C <= c < C_pad) stay zero."""
    HW = H * W
    yy, xx = np.meshgrid(np.arange(H), np.arange(W), indexing="ij")
    mask = np.zeros((9 * C_pad, N * HW), np.float32)
    for t, (dy, dx) in enumerate((dy, dx) for dy in range(3) for dx in range(3)):
        sy, sx = dy - 1, dx - 1
        valid = ((yy + sy >= 0) & (yy + sy < H) &
                 (xx + sx >= 0) & (xx + sx < W)).reshape(-1)            # (HW,)
        mask[t * C_pad: t * C_pad + C, :] = np.tile(valid, N)[None, :]
    return mask


@jax.jit
def relu_conv_bn(x_nchw, w_oihw, gamma, beta):
    """x: (N,C,H,W); w: (C,C,3,3) OIHW; gamma/beta: (C,). Returns NCHW float32."""
    N, C, H, W = x_nchw.shape
    HW = H * W
    C_pad = max(8, ((C + 7) // 8) * 8)   # 8-sublane-aligned im2col tap slabs

    # Cheap wrapper prep: contiguous reshape + zero-pad of the channel axis.
    x3 = jnp.pad(x_nchw.reshape(N, C, HW).astype(jnp.float32),
                 ((0, 0), (0, C_pad - C), (0, 0)))
    # Tiny weight prep (C*C*9 elems): OIHW -> (Cout, tap*C_pad), zero-padded K.
    w_mat = jnp.pad(jnp.transpose(w_oihw, (0, 2, 3, 1)),
                    ((0, 0), (0, 0), (0, 0), (0, C_pad - C)))
    w_mat = w_mat.reshape(C, 9 * C_pad).astype(MXU_DTYPE)
    mask = jnp.asarray(_tap_masks(N, C, C_pad, H, W))          # trace-time const
    gamma2 = gamma.reshape(C, 1).astype(jnp.float32)
    beta2 = beta.reshape(C, 1).astype(jnp.float32)

    y = pl.pallas_call(
        _make_fused_kernel(N, C, C_pad, H, W, BN_EPS),
        grid=(1,),
        in_specs=[
            pl.BlockSpec((N, C_pad, HW), lambda i: (0, 0, 0)),
            pl.BlockSpec((C, 9 * C_pad), lambda i: (0, 0)),
            pl.BlockSpec((9 * C_pad, N * HW), lambda i: (0, 0)),
            pl.BlockSpec((C, 1), lambda i: (0, 0)),
            pl.BlockSpec((C, 1), lambda i: (0, 0)),
        ],
        out_specs=pl.BlockSpec((N, C, HW), lambda i: (0, 0, 0)),
        out_shape=jax.ShapeDtypeStruct((N, C, HW), jnp.float32),
        compiler_params=pltpu.CompilerParams(
            dimension_semantics=("arbitrary",)),
    )(x3, w_mat, mask, gamma2, beta2)

    return y.reshape(N, C, H, W)   # free contiguous reshape back to NCHW


def _reference(x_nchw, w_oihw, gamma, beta, eps=BN_EPS):
    r = jnp.maximum(x_nchw, 0.0)
    conv = jax.lax.conv_general_dilated(
        r, w_oihw, window_strides=(1, 1), padding=((1, 1), (1, 1)),
        dimension_numbers=("NCHW", "OIHW", "NCHW"),
        precision=jax.lax.Precision.HIGHEST)
    mean = conv.mean(axis=(0, 2, 3), keepdims=True)
    var = jnp.mean((conv - mean) ** 2, axis=(0, 2, 3), keepdims=True)
    g = gamma.reshape(1, -1, 1, 1)
    b = beta.reshape(1, -1, 1, 1)
    return g * (conv - mean) / jnp.sqrt(var + eps) + b


if __name__ == "__main__":
    key = jax.random.PRNGKey(0)
    k_x, k_w, k_g, k_b = jax.random.split(key, 4)

    N, C, H, W = 2, 4, 16, 16  # planes = 4
    x = jax.random.normal(k_x, (N, C, H, W), dtype=jnp.float32)
    # Conv2d(planes, planes, 3, 1, 1, bias=False) weight: (C, C, 3, 3)
    fan_in = C * 3 * 3
    w = jax.random.uniform(k_w, (C, C, 3, 3), jnp.float32,
                           minval=-1.0, maxval=1.0) / np.sqrt(fan_in)
    # BatchNorm2d(planes) affine params (deterministic, non-trivial values).
    gamma = 1.0 + 0.1 * jax.random.normal(k_g, (C,), jnp.float32)
    beta = 0.1 * jax.random.normal(k_b, (C,), jnp.float32)

    out = relu_conv_bn(x, w, gamma, beta)
    out = jax.block_until_ready(out)

    ref = _reference(x, w, gamma, beta)
    assert out.shape == (N, C, H, W)
    # bf16 MXU operands (f32 accumulation) -> loosened tolerance; f32 path -> 1e-4.
    tol = 1e-4 if MXU_DTYPE == jnp.float32 else 3e-2
    assert np.allclose(np.asarray(out), np.asarray(ref), atol=tol, rtol=tol)

    print("KERNEL_OK")
</pallas_src>

<mosaic_0001>
module attributes {stable_mosaic.version = 11 : i64} {
  func.func @kernel(%arg0: i32, %arg1: memref<2x8x256xf32, #tpu.memory_space<vmem>>, %arg2: memref<4x72xbf16, #tpu.memory_space<vmem>>, %arg3: memref<72x512xf32, #tpu.memory_space<vmem>>, %arg4: memref<4x1xf32, #tpu.memory_space<vmem>>, %arg5: memref<4x1xf32, #tpu.memory_space<vmem>>, %arg6: memref<2x4x256xf32, #tpu.memory_space<vmem>>) attributes {dimension_semantics = [#tpu.dimension_semantics<arbitrary>], iteration_bounds = array<i64: 1>, scalar_prefetch = 0 : i64, scratch_operands = 0 : i64, tpu.core_type = #tpu.core_type<tc>, window_params = [{pipeline_mode = #tpu.pipeline_mode<synchronous>, transform_indices = @transform_0, window_bounds = array<i64: 2, 8, 256>}, {pipeline_mode = #tpu.pipeline_mode<synchronous>, transform_indices = @transform_1, window_bounds = array<i64: 4, 72>}, {pipeline_mode = #tpu.pipeline_mode<synchronous>, transform_indices = @transform_2, window_bounds = array<i64: 72, 512>}, {pipeline_mode = #tpu.pipeline_mode<synchronous>, transform_indices = @transform_3, window_bounds = array<i64: 4, 1>}, {pipeline_mode = #tpu.pipeline_mode<synchronous>, transform_indices = @transform_4, window_bounds = array<i64: 4, 1>}, {pipeline_mode = #tpu.pipeline_mode<synchronous>, transform_indices = @transform_5, window_bounds = array<i64: 2, 4, 256>}]} {
    %c0 = arith.constant 0 : index
    %c0_0 = arith.constant 0 : index
    %c0_1 = arith.constant 0 : index
    %0 = vector.load %arg1[%c0, %c0_0, %c0_1] : memref<2x8x256xf32, #tpu.memory_space<vmem>>, vector<1x8x256xf32>
    %1 = vector.shape_cast %0 : vector<1x8x256xf32> to vector<8x256xf32>
    %cst = arith.constant 0.000000e+00 : f32
    %2 = vector.broadcast %cst : f32 to vector<8x256xf32>
    %3 = arith.maximumf %1, %2 : vector<8x256xf32>
    %c1 = arith.constant 1 : index
    %c0_2 = arith.constant 0 : index
    %c0_3 = arith.constant 0 : index
    %4 = vector.load %arg1[%c1, %c0_2, %c0_3] : memref<2x8x256xf32, #tpu.memory_space<vmem>>, vector<1x8x256xf32>
    %5 = vector.shape_cast %4 : vector<1x8x256xf32> to vector<8x256xf32>
    %cst_4 = arith.constant 0.000000e+00 : f32
    %6 = vector.broadcast %cst_4 : f32 to vector<8x256xf32>
    %7 = arith.maximumf %5, %6 : vector<8x256xf32>
    %8 = tpu.concatenate %3, %7 in 1 : vector<8x256xf32>, vector<8x256xf32> -> vector<8x512xf32>
    %c17_i32 = arith.constant 17 : i32
    %9 = tpu.dynamic_rotate %8 by %c17_i32 dim 1 : vector<8x512xf32>, i32 -> vector<8x512xf32>
    %c16_i32 = arith.constant 16 : i32
    %10 = tpu.dynamic_rotate %8 by %c16_i32 dim 1 : vector<8x512xf32>, i32 -> vector<8x512xf32>
    %c15_i32 = arith.constant 15 : i32
    %11 = tpu.dynamic_rotate %8 by %c15_i32 dim 1 : vector<8x512xf32>, i32 -> vector<8x512xf32>
    %c1_i32 = arith.constant 1 : i32
    %12 = tpu.dynamic_rotate %8 by %c1_i32 dim 1 : vector<8x512xf32>, i32 -> vector<8x512xf32>
    %c511_i32 = arith.constant 511 : i32
    %13 = tpu.dynamic_rotate %8 by %c511_i32 dim 1 : vector<8x512xf32>, i32 -> vector<8x512xf32>
    %c497_i32 = arith.constant 497 : i32
    %14 = tpu.dynamic_rotate %8 by %c497_i32 dim 1 : vector<8x512xf32>, i32 -> vector<8x512xf32>
    %c496_i32 = arith.constant 496 : i32
    %15 = tpu.dynamic_rotate %8 by %c496_i32 dim 1 : vector<8x512xf32>, i32 -> vector<8x512xf32>
    %c495_i32 = arith.constant 495 : i32
    %16 = tpu.dynamic_rotate %8 by %c495_i32 dim 1 : vector<8x512xf32>, i32 -> vector<8x512xf32>
    %17 = tpu.concatenate %9, %10, %11, %12, %8, %13, %14, %15, %16 in 0 : vector<8x512xf32>, vector<8x512xf32>, vector<8x512xf32>, vector<8x512xf32>, vector<8x512xf32>, vector<8x512xf32>, vector<8x512xf32>, vector<8x512xf32>, vector<8x512xf32> -> vector<72x512xf32>
    %c0_5 = arith.constant 0 : index
    %c0_6 = arith.constant 0 : index
    %18 = vector.load %arg3[%c0_5, %c0_6] : memref<72x512xf32, #tpu.memory_space<vmem>>, vector<72x512xf32>
    %19 = arith.mulf %17, %18 : vector<72x512xf32>
    %c0_7 = arith.constant 0 : index
    %c0_8 = arith.constant 0 : index
    %20 = vector.load %arg2[%c0_7, %c0_8] : memref<4x72xbf16, #tpu.memory_space<vmem>>, vector<4x72xbf16>
    %21 = arith.truncf %19 : vector<72x512xf32> to vector<72x512xbf16>
    %cst_9 = arith.constant dense<0.000000e+00> : vector<4x512xf32>
    %22 = tpu.matmul %20, %21, %cst_9 {dimension_numbers = #tpu.dot_dimension_numbers<[1], [0], [0], [1], [0, 0, 1, 1], [], []>} : vector<4x72xbf16>, vector<72x512xbf16>, vector<4x512xf32> -> vector<4x512xf32>
    %cst_10 = arith.constant dense<0.000000e+00> : vector<4xf32>
    %23 = vector.multi_reduction <add>, %22, %cst_10 [1] : vector<4x512xf32> to vector<4xf32>
    %24 = vector.shape_cast %23 : vector<4xf32> to vector<4x1xf32>
    %cst_11 = arith.constant 0.001953125 : f32
    %25 = vector.broadcast %cst_11 : f32 to vector<4x1xf32>
    %26 = arith.mulf %24, %25 : vector<4x1xf32>
    %27 = vector.broadcast %26 : vector<4x1xf32> to vector<4x512xf32>
    %28 = arith.subf %22, %27 : vector<4x512xf32>
    %29 = arith.mulf %28, %28 : vector<4x512xf32>
    %cst_12 = arith.constant dense<0.000000e+00> : vector<4xf32>
    %30 = vector.multi_reduction <add>, %29, %cst_12 [1] : vector<4x512xf32> to vector<4xf32>
    %31 = vector.shape_cast %30 : vector<4xf32> to vector<4x1xf32>
    %cst_13 = arith.constant 0.001953125 : f32
    %32 = vector.broadcast %cst_13 : f32 to vector<4x1xf32>
    %33 = arith.mulf %31, %32 : vector<4x1xf32>
    %c0_14 = arith.constant 0 : index
    %c0_15 = arith.constant 0 : index
    %34 = vector.load %arg4[%c0_14, %c0_15] : memref<4x1xf32, #tpu.memory_space<vmem>>, vector<4x1xf32>
    %cst_16 = arith.constant 9.99999974E-6 : f32
    %35 = vector.broadcast %cst_16 : f32 to vector<4x1xf32>
    %36 = arith.addf %33, %35 : vector<4x1xf32>
    %37 = math.rsqrt %36 : vector<4x1xf32>
    %38 = arith.mulf %34, %37 : vector<4x1xf32>
    %39 = vector.broadcast %38 : vector<4x1xf32> to vector<4x512xf32>
    %40 = arith.mulf %28, %39 : vector<4x512xf32>
    %c0_17 = arith.constant 0 : index
    %c0_18 = arith.constant 0 : index
    %41 = vector.load %arg5[%c0_17, %c0_18] : memref<4x1xf32, #tpu.memory_space<vmem>>, vector<4x1xf32>
    %42 = vector.broadcast %41 : vector<4x1xf32> to vector<4x512xf32>
    %43 = arith.addf %40, %42 : vector<4x512xf32>
    %44 = vector.extract_strided_slice %43 {offsets = [0, 0], sizes = [4, 256], strides = [1, 1]} : vector<4x512xf32> to vector<4x256xf32>
    %c0_19 = arith.constant 0 : index
    %c0_20 = arith.constant 0 : index
    %c0_21 = arith.constant 0 : index
    %45 = vector.load %arg6[%c0_19, %c0_20, %c0_21] : memref<2x4x256xf32, #tpu.memory_space<vmem>>, vector<1x4x256xf32>
    %46 = vector.shape_cast %45 : vector<1x4x256xf32> to vector<4x256xf32>
    %47 = vector.shape_cast %44 : vector<4x256xf32> to vector<1x4x256xf32>
    tpu.vector_store %arg6[%c0_19, %c0_20, %c0_21], %47 {strides = array<i32>} : memref<2x4x256xf32, #tpu.memory_space<vmem>>, vector<1x4x256xf32>,
    %48 = vector.extract_strided_slice %43 {offsets = [0, 256], sizes = [4, 256], strides = [1, 1]} : vector<4x512xf32> to vector<4x256xf32>
    %c1_22 = arith.constant 1 : index
    %c0_23 = arith.constant 0 : index
    %c0_24 = arith.constant 0 : index
    %49 = vector.load %arg6[%c1_22, %c0_23, %c0_24] : memref<2x4x256xf32, #tpu.memory_space<vmem>>, vector<1x4x256xf32>
    %50 = vector.shape_cast %49 : vector<1x4x256xf32> to vector<4x256xf32>
    %51 = vector.shape_cast %48 : vector<4x256xf32> to vector<1x4x256xf32>
    tpu.vector_store %arg6[%c1_22, %c0_23, %c0_24], %51 {strides = array<i32>} : memref<2x4x256xf32, #tpu.memory_space<vmem>>, vector<1x4x256xf32>,
    return
  }
  func.func @transform_0(%arg0: i32) -> (i32, i32, i32) {
    %c0_i32 = arith.constant 0 : i32
    %c0_i32_0 = arith.constant 0 : i32
    %c0_i32_1 = arith.constant 0 : i32
    %c0_i32_2 = arith.constant 0 : i32
    return %c0_i32, %c0_i32_0, %c0_i32_1 : i32, i32, i32
  }
  func.func @transform_1(%arg0: i32) -> (i32, i32) {
    %c0_i32 = arith.constant 0 : i32
    %c0_i32_0 = arith.constant 0 : i32
    %c0_i32_1 = arith.constant 0 : i32
    return %c0_i32, %c0_i32_0 : i32, i32
  }
  func.func @transform_2(%arg0: i32) -> (i32, i32) {
    %c0_i32 = arith.constant 0 : i32
    %c0_i32_0 = arith.constant 0 : i32
    %c0_i32_1 = arith.constant 0 : i32
    return %c0_i32, %c0_i32_0 : i32, i32
  }
  func.func @transform_3(%arg0: i32) -> (i32, i32) {
    %c0_i32 = arith.constant 0 : i32
    %c0_i32_0 = arith.constant 0 : i32
    %c0_i32_1 = arith.constant 0 : i32
    return %c0_i32, %c0_i32_0 : i32, i32
  }
  func.func @transform_4(%arg0: i32) -> (i32, i32) {
    %c0_i32 = arith.constant 0 : i32
    %c0_i32_0 = arith.constant 0 : i32
    %c0_i32_1 = arith.constant 0 : i32
    return %c0_i32, %c0_i32_0 : i32, i32
  }
  func.func @transform_5(%arg0: i32) -> (i32, i32, i32) {
    %c0_i32 = arith.constant 0 : i32
    %c0_i32_0 = arith.constant 0 : i32
    %c0_i32_1 = arith.constant 0 : i32
    %c0_i32_2 = arith.constant 0 : i32
    return %c0_i32, %c0_i32_0, %c0_i32_1 : i32, i32, i32
  }
}

</mosaic_0001>

<bundles_post_ra>
// kernel: relu_conv_bn.1
= control target key start
LH: loop header
LB: loop body
LE: loop exit
PB: predicated region body
PF: predicated region fallthrough
CT: control target
= control target key end

     0   :  { %10 = vsyncpa [#allocation3], 0  ;;  %s441_s21 = smov [#allocation2]   ;;  %s442_s23 = smov 512   ;;  %s657_s0 = inlined_call_operand.vmem [shape: f32[2,8,256], index: 0, kind: input, shape index: {}]   ;;  %s658_s1 = inlined_call_operand.vmem [shape: bf16[4,72], index: 1, kind: input, shape index: {}]   ;;  %s659_s2 = inlined_call_operand.hbm [shape: f32[72,512], index: 2, kind: input, shape index: {}]   ;;  %s660_s3 = inlined_call_operand.vmem [shape: f32[4,1], index: 3, kind: input, shape index: {}]   ;;  %s661_s4 = inlined_call_operand.vmem [shape: f32[4,1], index: 4, kind: input, shape index: {}]   ;;  %s662_s5 = inlined_call_operand.vmem [shape: f32[2,4,256], index: 5, kind: output, shape index: {}]  }
   0x1   :  { %s19_s20 = sshll.u32 %s659_s2, 4  ;;  %s21_s22 = sshll.u32 %s441_s21, 4  ;;  %s20_s20 = int_to_ptr.hbm [resolvable:$true] %s19_s20  ;;  %s22_s22 = int_to_ptr.vmem [resolvable:$true] %s21_s22 }
   0x2   :  { %s443_s24 = smov 32  }
   0x3   :  { %27 = dma.hbm_to_vmem [thread:$0]  %s20_s20, 4608, %s22_s22, [#allocation3], %s442_s23, %s442_s23, %s443_s24  }
   0x4   :  { %439 = dma.done.wait [#allocation3], 4608  }
   0x5   :  { %440 = vsyncadd [#allocation3], 4294962688  ;;  %v392_v0 = vld [vmem:[%s657_s0 + $0x10] sm:$0xff]  ;;  %v37_v1 = vld [vmem:[%s657_s0] sm:$0xff]  ;;  %s444_s2 = smov 113   ;;  %s445_s29 = smov 111   ;;  %v54_v10 = vlaneseq }
   0x6   :  { %v492_v2 = vmax.f32 %v392_v0, 0.0  ;;  %v494_v3 = vmax.f32 %v37_v1, 0.0  ;;  %v393_v4 = vld [vmem:[%s657_s0 + $0x18] sm:$0xff]  ;;  %v38_v5 = vld [vmem:[%s657_s0 + $0x8] sm:$0xff]  ;;  %s446_s9 = smov 112   ;;  %s447_s0 = smov 127  }
   0x7   :  { %v505_v6 = vmax.f32 %v393_v4, 0.0  ;;  %v507_v7 = vmax.f32 %v38_v5, 0.0  ;;  %s448_s10 = smov 15   ;;  %s449_s11 = smov 1   ;;  %v542_v14 = vand.u32 127, %v54_v10  ;;  %v186_v15 = vld [vmem:[#allocation2 + $0x110] sm:$0xff] }
   0x8   :  { %117 = vrot.lane.b32.xlu2 %v492_v2, %s444_s2  ;;  %143 = vrot.lane.b32.xlu0 %v492_v2, %s445_s29  ;;  %s450_s12 = smov 17   ;;  %s451_s13 = smov 16   ;;  %v184_v17 = vld [vmem:[#allocation2 + $0x100] sm:$0xff]  ;;  %v185_v18 = vld [vmem:[#allocation2 + $0x108] sm:$0xff]  ;;  %v187_v19 = vld [vmem:[#allocation2 + $0x118] sm:$0xff]  ;;  %vm249_vm1 = vcmask 1043456  }
   0x9   :  { %139 = vrot.lane.b32.xlu1 %v494_v3, %s445_s29  ;;  %vm147_vm0 = vcmp.lt.s32.totalorder %v542_v14, 111  ;;  %vm121_vm2 = vcmp.lt.s32.totalorder %v542_v14, 113  ;;  %vm134_vm3 = vcmp.lt.s32.totalorder %v542_v14, 112  ;;  %v178_v38 = vld [vmem:[#allocation2 + $0xd0] sm:$0xff]  ;;  %v179_v48 = vld [vmem:[#allocation2 + $0xd8] sm:$0xff]  ;;  %vm108_vm4 = vcmp.lt.s32.totalorder %v542_v14, 127 }
   0xa   :  { %v182_v41 = vld [vmem:[#allocation2 + $0xf0] sm:$0xff]  ;;  %v175_v51 = vld [vmem:[#allocation2 + $0xb8] sm:$0xff]  ;;  %vm82_vm5 = vcmp.lt.s32.totalorder %v542_v14, 15  ;;  %vm95_vm6 = vcmp.lt.s32.totalorder %v542_v14, 1  ;;  %vm56_vm7 = vcmp.lt.s32.totalorder %v542_v14, 17  ;;  %vm69_vm8 = vcmp.lt.s32.totalorder %v542_v14, 16 }
   0xb   :  { %v170_v50 = vld [vmem:[#allocation2 + $0x90] sm:$0xff]  ;;  %v183_v53 = vld [vmem:[#allocation2 + $0xf8] sm:$0xff]  ;;  %vm245_vm9 = vcmask 588800  }
   0xc   :  { %v171_v54 = vld [vmem:[#allocation2 + $0x98] sm:$0xff]  ;;  %v174_v56 = vld [vmem:[#allocation2 + $0xb0] sm:$0xff]  ;;  %v206_v60 = vmul.f32 %v170_v50, %v492_v2 }
   0xd   :  { %v207_v0 = vmul.f32 %v171_v54, %v505_v6 }
  0x10   :  { %119 = vrot.lane.b32.xlu2 %v505_v6, %s444_s2  ;;  %145 = vrot.lane.b32.xlu0 %v505_v6, %s445_s29 }
  0x11   :  { %141 = vrot.lane.b32.xlu1 %v507_v7, %s445_s29 }
  0x18   :  { %130 = vrot.lane.b32.xlu0 %v492_v2, %s446_s9  ;;  %113 = vrot.lane.b32.xlu2 %v494_v3, %s444_s2 }
  0x19   :  { %132 = vrot.lane.b32.xlu1 %v505_v6, %s446_s9 }
  0x20   :  { %126 = vrot.lane.b32.xlu0 %v494_v3, %s446_s9  ;;  %106 = vrot.lane.b32.xlu2 %v505_v6, %s447_s0 }
  0x21   :  { %104 = vrot.lane.b32.xlu1 %v492_v2, %s447_s0 }
  0x28   :  { %115 = vrot.lane.b32.xlu0 %v507_v7, %s444_s2  ;;  %100 = vrot.lane.b32.xlu2 %v494_v3, %s447_s0 }
  0x29   :  { %128 = vrot.lane.b32.xlu1 %v507_v7, %s446_s9 }
  0x30   :  { %76 = vrot.lane.b32.xlu0 %v507_v7, %s448_s10  ;;  %89 = vrot.lane.b32.xlu2 %v507_v7, %s449_s11 }
  0x31   :  { %78 = vrot.lane.b32.xlu1 %v492_v2, %s448_s10 }
  0x38   :  { %91 = vrot.lane.b32.xlu0 %v492_v2, %s449_s11  ;;  %80 = vrot.lane.b32.xlu2 %v505_v6, %s448_s10 }
  0x39   :  { %102 = vrot.lane.b32.xlu1 %v507_v7, %s447_s0 }
  0x40   :  { %93 = vrot.lane.b32.xlu0 %v505_v6, %s449_s11  ;;  %50 = vrot.lane.b32.xlu2 %v492_v2, %s450_s12 }
  0x41   :  { %48 = vrot.lane.b32.xlu1 %v507_v7, %s450_s12 }
  0x48   :  { %63 = vrot.lane.b32.xlu0 %v507_v7, %s451_s13  ;;  %74 = vrot.lane.b32.xlu2 %v494_v3, %s448_s10 }
  0x49   :  { %65 = vrot.lane.b32.xlu1 %v492_v2, %s451_s13  ;;  %v181_v2 = vld [vmem:[#allocation2 + $0xe8] sm:$0xff] }
  0x50   :  { %87 = vrot.lane.b32.xlu0 %v494_v3, %s449_s11  ;;  %67 = vrot.lane.b32.xlu2 %v505_v6, %s451_s13 }
  0x51   :  { %52 = vrot.lane.b32.xlu1 %v505_v6, %s450_s12 }
  0x58   :  { %46 = vrot.lane.b32.xlu0 %v494_v3, %s450_s12 }
  0x59   :  { %61 = vrot.lane.b32.xlu1 %v494_v3, %s451_s13 }
  0x62   :  { %v538_v8 = vpop.permute.xlu2 %117 }
  0x6a   :  { %v120_v9 = vpop.permute.xlu2 %119 }
  0x6b   :  { %v122_v39 = vsel %vm121_vm2, %v538_v8, %v120_v9 }
  0x6c   :  { %v214_v44 = vmul.f32 %v178_v38, %v122_v39 }
  0x72   :  { %v540_v12 = vpop.permute.xlu2 %113 }
  0x73   :  { %v125_v49 = vsel %vm121_vm2, %v120_v9, %v540_v12 }
  0x74   :  { %v215_v57 = vmul.f32 %v179_v48, %v125_v49 }
  0x7a   :  { %v144_v11 = vpop.permute.xlu0 %143  ;;  %v107_v26 = vpop.permute.xlu2 %106 }
  0x7b   :  { %v140_v13 = vpop.permute.xlu1 %139 }
  0x82   :  { %v146_v16 = vpop.permute.xlu0 %145  ;;  %v556_v46 = vpop.permute.xlu2 %100 }
  0x83   :  { %v148_v20 = vsel %vm147_vm0, %v144_v11, %v146_v16  ;;  %v151_v21 = vsel %vm147_vm0, %v146_v16, %v140_v13  ;;  %v142_v22 = vpop.permute.xlu1 %141  ;;  %v112_v52 = vsel %vm108_vm4, %v107_v26, %v556_v46  ;;  %v180_v16 = vld [vmem:[#allocation2 + $0xe0] sm:$0xff] }
  0x84   :  { %v149_v23 = vsel %vm147_vm0, %v142_v22, %v144_v11  ;;  %v150_v24 = vsel %vm147_vm0, %v140_v13, %v142_v22  ;;  %v222_v25 = vmul.f32 %v186_v15, %v148_v20  ;;  %v223_v29 = vmul.f32 %v187_v19, %v151_v21  ;;  %v176_v11 = vld [vmem:[#allocation2 + $0xc0] sm:$0xff]  ;;  %v177_v13 = vld [vmem:[#allocation2 + $0xc8] sm:$0xff] }
  0x85   :  { %v220_v27 = vmul.f32 %v184_v17, %v150_v24  ;;  %v221_v28 = vmul.f32 %v185_v18, %v149_v23  ;;  %v211_v61 = vmul.f32 %v175_v51, %v112_v52  ;;  %v163_v51 = vld [vmem:[#allocation2 + $0x58] sm:$0xff] }
  0x86   :  { %v243_v30 = vpack.c.bf16 %v222_v25, %v222_v25  ;;  %v244_v33 = vpack.c.bf16 %v223_v29, %v223_v29  ;;  %v169_v29 = vld [vmem:[#allocation2 + $0x88] sm:$0xff] }
  0x87   :  { %v241_v31 = vpack.c.bf16 %v220_v27, %v220_v27  ;;  %v242_v32 = vpack.c.bf16 %v221_v28, %v221_v28  ;;  %v236_v9 = vpack.c.bf16 %v211_v61, %v207_v0  ;;  %v205_v39 = vmul.f32 %v169_v29, %v507_v7  ;;  %v167_v7 = vld [vmem:[#allocation2 + $0x78] sm:$0xff]  ;;  %v158_v61 = vld [vmem:[#allocation2 + $0x30] sm:$0xff] }
  0x88   :  { %v257_v34 = vsel %vm249_vm1, %v243_v30, 0  ;;  %v260_v37 = vsel %vm249_vm1, %v244_v33, 0  ;;  %v162_v30 = vld [vmem:[#allocation2 + $0x50] sm:$0xff] }
  0x89   :  { %v251_v35 = vsel %vm249_vm1, %v241_v31, 0  ;;  %v254_v36 = vsel %vm249_vm1, %v242_v32, 0  ;;  %291 = vmatpush.bf16.msra.mxu2 %v257_v34  ;;  %304 = vmatpush.bf16.msra.mxu3 %v260_v37  ;;  %v166_v32 = vld [vmem:[#allocation2 + $0x70] sm:$0xff]  ;;  %v172_v34 = vld [vmem:[#allocation2 + $0xa0] sm:$0xff] }
  0x8a   :  { %265 = vmatpush.bf16.msra.mxu0 %v251_v35  ;;  %278 = vmatpush.bf16.msra.mxu1 %v254_v36  ;;  %v131_v40 = vpop.permute.xlu0 %130  ;;  %v571_v10 = vpop.permute.xlu2 %89  ;;  %v173_v35 = vld [vmem:[#allocation2 + $0xa8] sm:$0xff] }
  0x8b   :  { %v133_v42 = vpop.permute.xlu1 %132 }
  0x8c   :  { %v135_v43 = vsel %vm134_vm3, %v131_v40, %v133_v42 }
  0x8d   :  { %v218_v45 = vmul.f32 %v182_v41, %v135_v43 }
  0x8f   :  { %v239_v47 = vpack.c.bf16 %v218_v45, %v214_v44 }
  0x91   :  { %292 = vmatpush.bf16.msra.mxu2 %v239_v47 }
  0x92   :  { %v127_v55 = vpop.permute.xlu0 %126  ;;  %v81_v27 = vpop.permute.xlu2 %80 }
  0x93   :  { %v138_v58 = vsel %vm134_vm3, %v133_v42, %v127_v55  ;;  %v105_v59 = vpop.permute.xlu1 %104 }
  0x94   :  { %v219_v62 = vmul.f32 %v183_v53, %v138_v58  ;;  %v109_v63 = vsel %vm108_vm4, %v105_v59, %v107_v26  ;;  %v154_v58 = vld [vmem:[#allocation2 + $0x10] sm:$0xff] }
  0x95   :  { %v210_v1 = vmul.f32 %v174_v56, %v109_v63 }
  0x96   :  { %v240_v4 = vpack.c.bf16 %v219_v62, %v215_v57 }
  0x97   :  { %v235_v5 = vpack.c.bf16 %v210_v1, %v206_v60 }
  0x98   :  { %305 = vmatpush.bf16.msra.mxu3 %v240_v4 }
  0x99   :  { %293 = vmatpush.bf16.msra.mxu2 %v235_v5 }
  0x9a   :  { %v116_v15 = vpop.permute.xlu0 %115  ;;  %v51_v44 = vpop.permute.xlu2 %50 }
  0x9b   :  { %v123_v17 = vsel %vm121_vm2, %v116_v15, %v538_v8  ;;  %v124_v6 = vsel %vm121_vm2, %v540_v12, %v116_v15  ;;  %v129_v18 = vpop.permute.xlu1 %128  ;;  %v168_v12 = vld [vmem:[#allocation2 + $0x80] sm:$0xff] }
  0x9c   :  { %v212_v19 = vmul.f32 %v176_v11, %v124_v6  ;;  %v213_v20 = vmul.f32 %v177_v13, %v123_v17  ;;  %v136_v21 = vsel %vm134_vm3, %v129_v18, %v131_v40  ;;  %v137_v22 = vsel %vm134_vm3, %v127_v55, %v129_v18  ;;  %306 = vmatpush.bf16.msra.mxu3 %v236_v9  ;;  %v160_v9 = vld [vmem:[#allocation2 + $0x40] sm:$0xff]  ;;  %v161_v11 = vld [vmem:[#allocation2 + $0x48] sm:$0xff]  ;;  %v159_v6 = vld [vmem:[#allocation2 + $0x38] sm:$0xff] }
  0x9d   :  { %v216_v23 = vmul.f32 %v180_v16, %v137_v22  ;;  %v217_v24 = vmul.f32 %v181_v2, %v136_v21  ;;  %v204_v38 = vmul.f32 %v168_v12, %v494_v3  ;;  %v164_v16 = vld [vmem:[#allocation2 + $0x60] sm:$0xff]  ;;  %v165_v2 = vld [vmem:[#allocation2 + $0x68] sm:$0xff] }
  0x9e   :  { %v224_v17 = vld [vmem:[%s658_s1] sm:$0x3] }
  0x9f   :  { %v237_v25 = vpack.c.bf16 %v216_v23, %v212_v19  ;;  %v238_v26 = vpack.c.bf16 %v217_v24, %v213_v20  ;;  %v155_v20 = vld [vmem:[#allocation2 + $0x18] sm:$0xff] }
  0xa1   :  { %266 = vmatpush.bf16.msra.mxu0 %v237_v25  ;;  %279 = vmatpush.bf16.msra.mxu1 %v238_v26 }
  0xa2   :  { %v77_v8 = vpop.permute.xlu0 %76  ;;  %v75_v57 = vpop.permute.xlu2 %74 }
  0xa3   :  { %v79_v28 = vpop.permute.xlu1 %78  ;;  %v86_v13 = vsel %vm82_vm5, %v81_v27, %v75_v57  ;;  %v85_v15 = vsel %vm82_vm5, %v75_v57, %v77_v8 }
  0xa4   :  { %v84_v31 = vsel %vm82_vm5, %v77_v8, %v79_v28  ;;  %v83_v3 = vsel %vm82_vm5, %v79_v28, %v81_v27  ;;  %v196_v21 = vmul.f32 %v160_v9, %v86_v13  ;;  %v197_v25 = vmul.f32 %v161_v11, %v85_v15 }
  0xa5   :  { %v198_v40 = vmul.f32 %v162_v30, %v84_v31 }
  0xaa   :  { %v92_v33 = vpop.permute.xlu0 %91  ;;  %v68_v4 = vpop.permute.xlu2 %67 }
  0xab   :  { %v97_v36 = vsel %vm95_vm6, %v571_v10, %v92_v33  ;;  %v103_v37 = vpop.permute.xlu1 %102 }
  0xac   :  { %v202_v41 = vmul.f32 %v166_v32, %v97_v36  ;;  %v110_v42 = vsel %vm108_vm4, %v103_v37, %v105_v59  ;;  %v111_v43 = vsel %vm108_vm4, %v556_v46, %v103_v37  ;;  %v199_v46 = vmul.f32 %v163_v51, %v83_v3  ;;  %v153_v32 = vld [vmem:[#allocation2 + $0x8] sm:$0xff] }
  0xad   :  { %v208_v45 = vmul.f32 %v172_v34, %v111_v43  ;;  %v209_v47 = vmul.f32 %v173_v35, %v110_v42  ;;  %v156_v34 = vld [vmem:[#allocation2 + $0x20] sm:$0xff]  ;;  %v157_v35 = vld [vmem:[#allocation2 + $0x28] sm:$0xff] }
  0xae   :  { %v231_v48 = vpack.c.bf16 %v202_v41, %v198_v40 }
  0xaf   :  { %v233_v49 = vpack.c.bf16 %v208_v45, %v204_v38  ;;  %v234_v50 = vpack.c.bf16 %v209_v47, %v205_v39 }
  0xb0   :  { %294 = vmatpush.bf16.msra.mxu2 %v231_v48 }
  0xb1   :  { %267 = vmatpush.bf16.msra.mxu0 %v233_v49  ;;  %280 = vmatpush.bf16.msra.mxu1 %v234_v50 }
  0xb2   :  { %v94_v52 = vpop.permute.xlu0 %93 }
  0xb3   :  { %v96_v53 = vsel %vm95_vm6, %v92_v33, %v94_v52  ;;  %v49_v54 = vpop.permute.xlu1 %48 }
  0xb4   :  { %v203_v55 = vmul.f32 %v167_v7, %v96_v53  ;;  %v58_v59 = vsel %vm56_vm7, %v49_v54, %v51_v44 }
  0xb5   :  { %v190_v0 = vmul.f32 %v154_v58, %v58_v59 }
  0xb6   :  { %v232_v56 = vpack.c.bf16 %v203_v55, %v199_v46 }
  0xb8   :  { %307 = vmatpush.bf16.msra.mxu3 %v232_v56 }
  0xba   :  { %v64_v60 = vpop.permute.xlu0 %63 }
  0xbb   :  { %v66_v62 = vpop.permute.xlu1 %65 }
  0xbc   :  { %v71_v63 = vsel %vm69_vm8, %v64_v60, %v66_v62  ;;  %v70_v18 = vsel %vm69_vm8, %v66_v62, %v68_v4 }
  0xbd   :  { %v194_v1 = vmul.f32 %v158_v61, %v71_v63  ;;  %v195_v28 = vmul.f32 %v159_v6, %v70_v18  ;;  %v452_v18 = vmov 0  }
  0xbe   :  { %411 = vset.pattern.permute.xlu1 %v452_v18  ;;  %412 = vset.pattern.permute.xlu0 %v452_v18 }
  0xbf   :  { %v227_v5 = vpack.c.bf16 %v194_v1, %v190_v0 }
  0xc1   :  { %295 = vmatpush.bf16.msra.mxu2 %v227_v5 }
  0xc2   :  { %v88_v19 = vpop.permute.xlu0 %87 }
  0xc3   :  { %v98_v22 = vsel %vm95_vm6, %v88_v19, %v571_v10  ;;  %v99_v23 = vsel %vm95_vm6, %v94_v52, %v88_v19  ;;  %v53_v24 = vpop.permute.xlu1 %52  ;;  %v152_v10 = vld [vmem:[#allocation2] sm:$0xff] }
  0xc4   :  { %v200_v26 = vmul.f32 %v164_v16, %v99_v23  ;;  %v201_v8 = vmul.f32 %v165_v2, %v98_v22  ;;  %v57_v27 = vsel %vm56_vm7, %v51_v44, %v53_v24  ;;  %396 = vmatmul.msk.bf16.vlgmr.msra.gmra.mxu2 %vm245_vm9, %v224_v17 }
  0xc5   :  { %v191_v12 = vmul.f32 %v155_v20, %v57_v27 }
  0xc6   :  { %v229_v29 = vpack.c.bf16 %v200_v26, %v196_v21  ;;  %v230_v30 = vpack.c.bf16 %v201_v8, %v197_v25  ;;  %v342_v8 = vld [vmem:[%s660_s3] sm:$0xf] }
  0xc7   :  { %v228_v31 = vpack.c.bf16 %v195_v28, %v191_v12 }
  0xc8   :  { %268 = vmatpush.bf16.msra.mxu0 %v229_v29  ;;  %281 = vmatpush.bf16.msra.mxu1 %v230_v30  ;;  %v364_v29 = vld [vmem:[%s661_s4] sm:$0xf] }
  0xc9   :  { %308 = vmatpush.bf16.msra.mxu3 %v228_v31 }
  0xca   :  { %v47_v33 = vpop.permute.xlu0 %46 }
  0xcb   :  { %v59_v36 = vsel %vm56_vm7, %v47_v33, %v49_v54  ;;  %v60_v37 = vsel %vm56_vm7, %v53_v24, %v47_v33  ;;  %v62_v38 = vpop.permute.xlu1 %61 }
  0xcc   :  { %v188_v39 = vmul.f32 %v152_v10, %v60_v37  ;;  %v189_v40 = vmul.f32 %v153_v32, %v59_v36  ;;  %v72_v41 = vsel %vm69_vm8, %v62_v38, %v64_v60  ;;  %v73_v42 = vsel %vm69_vm8, %v68_v4, %v62_v38  ;;  %397 = vmatmul.msk.bf16.vlgmr.msra.gmra.mxu3 %vm245_vm9, %v224_v17 }
  0xcd   :  { %v192_v43 = vmul.f32 %v156_v34, %v73_v42  ;;  %v193_v44 = vmul.f32 %v157_v35, %v72_v41 }
  0xcf   :  { %v225_v45 = vpack.c.bf16 %v192_v43, %v188_v39  ;;  %v226_v47 = vpack.c.bf16 %v193_v44, %v189_v40 }
  0xd1   :  { %269 = vmatpush.bf16.msra.mxu0 %v225_v45  ;;  %282 = vmatpush.bf16.msra.mxu1 %v226_v47 }
  0xd4   :  { %394 = vmatmul.msk.bf16.vlgmr.msra.gmra.mxu0 %vm245_vm9, %v224_v17  ;;  %395 = vmatmul.msk.bf16.vlgmr.msra.gmra.mxu1 %vm245_vm9, %v224_v17 }
 0x147   :  { %v297_v48 = vpop.f32.mrf.mxu2 }
 0x148   :  { %v317_v14 = vsel %vm249_vm1, %v297_v48, 0.0 }
 0x14f   :  { %v310_v49 = vpop.f32.mrf.mxu3  ;;  %v299_v50 = vpop.f32.mrf.mxu2 }
 0x150   :  { %v319_v54 = vsel %vm249_vm1, %v310_v49, 0.0 }
 0x151   :  { %v271_v51 = vpop.f32.mrf.mxu0  ;;  %v284_v3 = vpop.f32.mrf.mxu1 }
 0x152   :  { %v314_v7 = vsel %vm249_vm1, %v271_v51, 0.0  ;;  %v315_v52 = vsel %vm249_vm1, %v284_v3, 0.0 }
 0x153   :  { %v316_v53 = vadd.f32 %v315_v52, %v314_v7 }
 0x155   :  { %v318_v46 = vadd.f32 %v317_v14, %v316_v53 }
 0x157   :  { %v312_v55 = vpop.f32.mrf.mxu3  ;;  %v320_v56 = vadd.f32 %v319_v54, %v318_v46 }
 0x159   :  { %v286_v57 = vpop.f32.mrf.mxu1  ;;  %321 = vadd.xlane.f32.xlu2 %v320_v56  ;;  %v273_v58 = vpop.f32.mrf.mxu0 }
 0x1cc   :  { %v322_v59 = vpop.xlane.xlu2 %321 }
 0x1cd   :  { %v323_v60 = vmul.f32 0.001953125, %v322_v59 }
 0x1cf   :  { %v324_v61 = vsub.f32 %v271_v51, %v323_v60  ;;  %v325_v62 = vsub.f32 %v284_v3, %v323_v60  ;;  %v326_v63 = vsub.f32 %v297_v48, %v323_v60  ;;  %v327_v0 = vsub.f32 %v310_v49, %v323_v60 }
 0x1d1   :  { %v328_v1 = vmul.f32 %v324_v61, %v324_v61  ;;  %v329_v4 = vmul.f32 %v325_v62, %v325_v62  ;;  %v330_v5 = vmul.f32 %v326_v63, %v326_v63  ;;  %v331_v9 = vmul.f32 %v327_v0, %v327_v0 }
 0x1d3   :  { %v332_v11 = vsel %vm249_vm1, %v328_v1, 0.0  ;;  %v333_v13 = vsel %vm249_vm1, %v329_v4, 0.0  ;;  %v335_v16 = vsel %vm249_vm1, %v330_v5, 0.0  ;;  %v337_v17 = vsel %vm249_vm1, %v331_v9, 0.0 }
 0x1d4   :  { %v334_v15 = vadd.f32 %v333_v13, %v332_v11 }
 0x1d6   :  { %v336_v2 = vadd.f32 %v335_v16, %v334_v15 }
 0x1d8   :  { %v338_v6 = vadd.f32 %v337_v17, %v336_v2 }
 0x1da   :  { %339 = vadd.xlane.f32.xlu0 %v338_v6 }
 0x24d   :  { %v340_v19 = vpop.xlane.xlu0 %339 }
 0x24e   :  { %v341_v20 = vmul.f32 0.001953125, %v340_v19 }
 0x250   :  { %v343_v21 = vadd.f32 1e-05, %v341_v20 }
 0x252   :  { %413 = vrsqrt.f32 %v343_v21  ;;  %vm350_vm11 = vweird.f32 %v343_v21 }
 0x258   :  { %v414_v22 = vpop.eup %413 }
 0x259   :  { %v345_v23 = vmul.f32 %v414_v22, %v343_v21  ;;  %vm351_vm10 = vweird.f32 %v414_v22 }
 0x25a   :  { %vm352_vm12 = vmor %vm350_vm11, %vm351_vm10 }
 0x25b   :  { %v346_v24 = vmul.f32 %v414_v22, %v345_v23 }
 0x25d   :  { %v347_v25 = vmul.f32 0.5, %v346_v24 }
 0x25f   :  { %v348_v26 = vsub.f32 1.5, %v347_v25 }
 0x261   :  { %v349_v27 = vmul.f32 %v414_v22, %v348_v26 }
 0x263   :  { %v353_v28 = vsel %vm352_vm12, %v414_v22, %v349_v27 }
 0x264   :  { %v354_v12 = vmul.f32 %v353_v28, %v342_v8 }
 0x266   :  { %357 = vperm.xlu1 %411, %v354_v12  }
 0x26e   :  { %367 = vperm.xlu1 %411, %v364_v29  }
 0x2d8   :  { %v358_v30 = vpop.permute.xlu1 %357 }
 0x2d9   :  { %v361_v31 = vmul.f32 %v358_v30, %v325_v62  ;;  %v363_v10 = vmul.f32 %v358_v30, %v327_v0  ;;  %v360_v33 = vmul.f32 %v358_v30, %v324_v61  ;;  %v362_v34 = vmul.f32 %v358_v30, %v326_v63 }
 0x2e0   :  { %v368_v32 = vpop.permute.xlu1 %367 }
 0x2e1   :  { %v371_v35 = vadd.f32 %v368_v32, %v361_v31  ;;  %v373_v36 = vadd.f32 %v368_v32, %v363_v10  ;;  %v370_v37 = vadd.f32 %v368_v32, %v360_v33  ;;  %v372_v38 = vadd.f32 %v368_v32, %v362_v34 }
 0x2e3   :  { %v376_v39 = vrot.slane %v371_v35, 4  ;;  %v382_v40 = vrot.slane %v373_v36, 4 }
 0x2e5   :  { %v377_v41 = vsel %vm249_vm1, %v370_v37, %v376_v39  ;;  %v383_v42 = vsel %vm249_vm1, %v372_v38, %v382_v40 }
 0x2e6   :  { %379 = vst [vmem:[%s662_s5] sm:$0xff] %v377_v41 }
 0x2e7   :  { %398 = vst [vmem:[%s662_s5 + $0x8] sm:$0xff] %v383_v42 }
 0x2e8   :  { %391 = vsyncpa [#allocation3], 1 }

</bundles_post_ra>
